<compile_context>
chip_gen: v7x
topology: tpu7x:2x2x1
jax: 0.10.0
libtpu: 0.0.40
codegen_flags: <defaults>
</compile_context>

<pallas_src>
import math
import functools

import jax
import jax.numpy as jnp
from jax.experimental import pallas as pl
from jax.experimental.pallas import tpu as pltpu


def _round_up(x, m):
    return ((x + m - 1) // m) * m


def _pad2d(a, rows, cols):
    pr = rows - a.shape[0]
    pc = cols - a.shape[1]
    if pr or pc:
        a = jnp.pad(a, ((0, pr), (0, pc)))
    return a


def _vmem_cap_bytes():
    # Per-generation VMEM budget: ~100 MiB on v5e/v6e (128 MiB physical),
    # ~50 MiB on v7x (64 MiB physical per TensorCore).
    try:
        phys = int(pltpu.get_tpu_info().vmem_capacity_bytes)
    except Exception:
        phys = 64 * 1024 * 1024          # conservative fallback (v7x-sized)
    return int(phys * 0.78)


def _gcn_kernel(adj_ref, x_ref, h0_ref, w1_ref, w2_ref, out_ref,
                hi_acc, h0w_acc, *, tile_k, x_resident):
    k = pl.program_id(1)

    @pl.when(k == 0)
    def _():
        hi_acc[...] = jnp.zeros_like(hi_acc)
        # Full h0 contribution (theta*h0@W2 + (1-theta)*alpha*h0 via the folded
        # W2') is computed once per row tile, overlapped with the adj@x
        # reduction's DMA stream instead of serializing into the epilogue.
        h0w_acc[...] = jnp.dot(h0_ref[...], w2_ref[...],
                               preferred_element_type=jnp.float32)

    adj_tile = adj_ref[...]
    if adj_tile.dtype != w1_ref.dtype:
        # In-kernel cast (VPU work hidden under DMA/MXU) instead of a wrapper
        # side full-HBM pad+cast pre-pass over the N x N adjacency.
        adj_tile = adj_tile.astype(w1_ref.dtype)

    if x_resident:
        # x lives fully in VMEM (single-buffered, fetched once for the whole
        # grid) -> no per-row-tile re-streaming of x from HBM.
        start = pl.multiple_of(k * tile_k, 128)
        x_tile = x_ref[pl.ds(start, tile_k), :]
    else:
        x_tile = x_ref[...]

    # hi += adj_tile @ x_tile    (MXU, f32 accumulation in VMEM scratch)
    hi_acc[...] += jnp.dot(adj_tile, x_tile, preferred_element_type=jnp.float32)

    @pl.when(k == pl.num_programs(1) - 1)
    def _():
        hi_w = jnp.dot(hi_acc[...].astype(w1_ref.dtype), w1_ref[...],
                       preferred_element_type=jnp.float32)
        out_ref[...] = (hi_w + h0w_acc[...]).astype(out_ref.dtype)


def main_graph_convolution(x, adj, rxyz, rlam, weight, t, alpha, l, *,
                           tile_n=None, tile_k=None,
                           compute_dtype=jnp.bfloat16,
                           x_resident_bytes=16 * 1024 * 1024):
    """Pallas implementation of MainGraphConvolution.forward.

    x:      [N, D]   node features
    adj:    [N, N]   (dense) adjacency — torch.spmm(adj, input) == adj @ input.
                     Passed through in its own dtype (no full-HBM cast pre-pass);
                     the kernel casts each tile to `compute_dtype` for the MXU.
    rxyz:   [N, D1], rlam: [N, D2]  with D1 + D2 == D
    weight: [2D, D]  (in_features = 2D, out_features = D)
    """
    N, D = x.shape
    assert adj.shape == (N, N)
    assert rxyz.shape[0] == N and rlam.shape[0] == N
    assert rxyz.shape[1] + rlam.shape[1] == D
    assert weight.shape == (2 * D, D)

    theta = float(math.log(t / l + 1.0))
    alpha = float(alpha)

    adj_isz = jnp.dtype(adj.dtype).itemsize
    cdt_isz = jnp.dtype(compute_dtype).itemsize

    # ---- tiling geometry (lane-dense: all last dims multiples of 128) -------
    D_pad = _round_up(D, 128)
    N128 = _round_up(N, 128)
    cap = _vmem_cap_bytes()

    user_tile_n = tile_n is not None
    # Defaults sized so each grid step streams multi-MiB of adjacency, which
    # amortizes the ~0.35us per-step pipeline overhead on v5e/v6e/v7x.
    tile_n = _round_up(min(tile_n or 512, N128), 128)
    tile_k = _round_up(min(tile_k or 2048, N128), 128)
    # v7x megacore: give the "parallel" row axis >= 2 tiles when possible so it
    # can be sharded across the 2 TensorCores.
    if not user_tile_n and tile_n >= N128 and N128 >= 256:
        tile_n = _round_up(N128 // 2, 128)

    def n_col(tk):
        return _round_up(N, tk)

    # Keep x fully VMEM-resident when small -> fetched exactly once.
    x_resident = n_col(tile_k) * D_pad * cdt_isz <= min(x_resident_bytes, cap // 4)

    def vmem_bytes(tn, tk, x_res):
        b = 2 * tn * tk * adj_isz                                    # adj (x2 buf)
        b += (n_col(tk) * D_pad * cdt_isz) if x_res else (2 * tk * D_pad * cdt_isz)
        b += 2 * tn * D_pad * cdt_isz                                # h0 (x2 buf)
        b += 2 * D_pad * D_pad * cdt_isz                             # W1'+W2' (x1 buf)
        b += 2 * tn * D_pad * 4                                      # out (x2 buf, f32)
        b += 2 * tn * D_pad * 4                                      # hi_acc + h0w_acc
        return b

    # Shrink tiles until the estimate fits the per-generation VMEM cap.
    while vmem_bytes(tile_n, tile_k, x_resident) > cap and tile_k > 128:
        tile_k = max(128, tile_k // 2)
    while vmem_bytes(tile_n, tile_k, x_resident) > cap and tile_n > 128:
        tile_n = max(128, tile_n // 2)
    if vmem_bytes(tile_n, tile_k, x_resident) > cap:
        x_resident = False
    # TODO(synk): for very large D (D_pad >= ~1024) also tile the output-feature
    # axis of W1'/W2' (3rd grid axis) instead of keeping both [D_pad, D_pad]
    # weights resident — matters on v7x's 64 MiB VMEM.

    N_row = _round_up(N, tile_n)
    N_col = _round_up(N, tile_k)

    # ---- wrapper-side glue (small arrays only; adj is NOT re-written/cast) --
    # Fold the theta/alpha blend into the weights (exact algebra):
    #   out = hi @ W1' + h0 @ W2'
    w_f32 = weight.astype(jnp.float32)
    eye = jnp.eye(D, dtype=jnp.float32)
    w1 = theta * w_f32[:D, :] + (1.0 - theta) * (1.0 - alpha) * eye
    w2 = theta * w_f32[D:, :] + (1.0 - theta) * alpha * eye

    h0 = jnp.concatenate([rxyz, rlam], axis=1)                        # [N, D]
    adj_p = _pad2d(adj, N_row, N_col)                                 # dtype kept
    x_p = _pad2d(x, N_col, D_pad).astype(compute_dtype)
    h0_p = _pad2d(h0, N_row, D_pad).astype(compute_dtype)
    w1_p = _pad2d(w1, D_pad, D_pad).astype(compute_dtype)
    w2_p = _pad2d(w2, D_pad, D_pad).astype(compute_dtype)

    grid = (N_row // tile_n, N_col // tile_k)
    kernel = functools.partial(_gcn_kernel, tile_k=tile_k, x_resident=x_resident)

    if x_resident:
        x_spec = pl.BlockSpec((N_col, D_pad), lambda i, k: (0, 0),
                              pipeline_mode=pl.Buffered(1))
    else:
        x_spec = pl.BlockSpec((tile_k, D_pad), lambda i, k: (k, 0))

    vmem_limit = min(max(int(vmem_bytes(tile_n, tile_k, x_resident) * 1.3)
                         + (2 << 20), 32 * 1024 * 1024), cap)

    x_reads = 1 if x_resident else (N_row // tile_n)
    cost = pl.CostEstimate(
        flops=2 * N * N * D + 4 * N * D * D,
        transcendentals=0,
        bytes_accessed=int(N_row * N_col * adj_isz
                           + x_reads * N_col * D_pad * cdt_isz
                           + N_row * D_pad * cdt_isz
                           + 2 * D_pad * D_pad * cdt_isz
                           + N_row * D_pad * 4),
    )

    out = pl.pallas_call(
        kernel,
        out_shape=jax.ShapeDtypeStruct((N_row, D_pad), jnp.float32),
        grid=grid,
        in_specs=[
            pl.BlockSpec((tile_n, tile_k), lambda i, k: (i, k)),      # adj tile
            x_spec,                                                   # x
            pl.BlockSpec((tile_n, D_pad), lambda i, k: (i, 0)),       # h0 rows
            pl.BlockSpec((D_pad, D_pad), lambda i, k: (0, 0),         # W1' (resident,
                         pipeline_mode=pl.Buffered(1)),               #  single-buffered)
            pl.BlockSpec((D_pad, D_pad), lambda i, k: (0, 0),         # W2'
                         pipeline_mode=pl.Buffered(1)),
        ],
        out_specs=pl.BlockSpec((tile_n, D_pad), lambda i, k: (i, 0)),
        scratch_shapes=[pltpu.VMEM((tile_n, D_pad), jnp.float32),     # hi accumulator
                        pltpu.VMEM((tile_n, D_pad), jnp.float32)],    # h0 @ W2'
        compiler_params=pltpu.CompilerParams(
            dimension_semantics=("parallel", "arbitrary"),
            vmem_limit_bytes=vmem_limit),
        cost_estimate=cost,
    )(adj_p, x_p, h0_p, w1_p, w2_p)

    # TODO(synk): if the real adjacency is sparse (torch.spmm), do not densify —
    # use pltpu.PrefetchScalarGridSpec with CSR block offsets so the k-loop only
    # visits nonzero adj tiles (10-100x less HBM traffic at typical GCN density).
    return out[:N, :D]


def reference(x, adj, rxyz, rlam, weight, t, alpha, l):
    theta = math.log(t / l + 1.0)
    hi = adj @ x
    h0 = jnp.concatenate([rxyz, rlam], axis=1)
    support = jnp.concatenate([hi, h0], axis=1)
    r = (1.0 - alpha) * hi + alpha * h0
    return theta * (support @ weight) + (1.0 - theta) * r


if __name__ == "__main__":
    def make_inputs(key, N, D, D1):
        D2 = D - D1
        k_x, k_adj, k_rx, k_rl, k_w = jax.random.split(key, 5)
        x = jax.random.normal(k_x, (N, D), dtype=jnp.float32)
        adj = jax.random.uniform(k_adj, (N, N), dtype=jnp.float32)
        adj = adj / jnp.sum(adj, axis=1, keepdims=True)   # row-normalized GCN adj
        rxyz = jax.random.normal(k_rx, (N, D1), dtype=jnp.float32)
        rlam = jax.random.normal(k_rl, (N, D2), dtype=jnp.float32)
        # reset_parameters(): uniform(-stdv, stdv), stdv = 1/sqrt(out_features)
        stdv = 1.0 / math.sqrt(D)
        weight = jax.random.uniform(k_w, (2 * D, D), dtype=jnp.float32,
                                    minval=-stdv, maxval=stdv)
        return x, adj, rxyz, rlam, weight

    t, alpha, l = 2.0, 0.1, 1

    # Case 1: small module-consistent shapes, f32 MXU path (tight tolerance).
    x, adj, rxyz, rlam, w = make_inputs(jax.random.PRNGKey(0), N=32, D=32, D1=16)
    out = jax.block_until_ready(
        main_graph_convolution(x, adj, rxyz, rlam, w, t, alpha, l,
                               compute_dtype=jnp.float32))
    ref = reference(x, adj, rxyz, rlam, w, t, alpha, l)
    assert out.shape == ref.shape
    assert jnp.allclose(out, ref, atol=5e-4, rtol=5e-4), \
        float(jnp.max(jnp.abs(out - ref)))

    # Case 2: non-tile-aligned N/D (padding + in-kernel f32->bf16 adj cast,
    # resident x, auto tile selection, 2-way parallel row axis).
    x, adj, rxyz, rlam, w = make_inputs(jax.random.PRNGKey(1), N=200, D=96, D1=32)
    out = jax.block_until_ready(
        main_graph_convolution(x, adj, rxyz, rlam, w, t, alpha, l))
    ref = reference(x, adj, rxyz, rlam, w, t, alpha, l)
    assert out.shape == ref.shape
    assert jnp.allclose(out, ref, atol=5e-2, rtol=5e-2), \
        float(jnp.max(jnp.abs(out - ref)))

    # Case 3: force small tiles + K-streamed (non-resident) x to exercise the
    # multi-step reduction and the fallback x path.
    out = jax.block_until_ready(
        main_graph_convolution(x, adj, rxyz, rlam, w, t, alpha, l,
                               tile_n=128, tile_k=128, x_resident_bytes=0))
    assert jnp.allclose(out, ref, atol=5e-2, rtol=5e-2), \
        float(jnp.max(jnp.abs(out - ref)))

    print("KERNEL_OK")
</pallas_src>

<mosaic_0001>
module attributes {stable_mosaic.version = 11 : i64} {
  func.func @_gcn_kernel(%arg0: i32, %arg1: i32, %arg2: memref<128x128xf32, #tpu.memory_space<vmem>>, %arg3: memref<128x128xf32, #tpu.memory_space<vmem>>, %arg4: memref<128x128xf32, #tpu.memory_space<vmem>>, %arg5: memref<128x128xf32, #tpu.memory_space<vmem>>, %arg6: memref<128x128xf32, #tpu.memory_space<vmem>>, %arg7: memref<128x128xf32, #tpu.memory_space<vmem>>, %arg8: memref<128x128xf32, #tpu.memory_space<vmem>>, %arg9: memref<128x128xf32, #tpu.memory_space<vmem>>) attributes {dimension_semantics = [#tpu.dimension_semantics<parallel>, #tpu.dimension_semantics<arbitrary>], iteration_bounds = array<i64: 1, 1>, scalar_prefetch = 0 : i64, scratch_operands = 2 : i64, tpu.core_type = #tpu.core_type<tc>, window_params = [{transform_indices = @transform_0, window_bounds = array<i64: 128, 128>}, {pipeline_mode = #tpu.pipeline_mode<synchronous>, transform_indices = @transform_1, window_bounds = array<i64: 128, 128>}, {transform_indices = @transform_2, window_bounds = array<i64: 128, 128>}, {pipeline_mode = #tpu.pipeline_mode<synchronous>, transform_indices = @transform_3, window_bounds = array<i64: 128, 128>}, {pipeline_mode = #tpu.pipeline_mode<synchronous>, transform_indices = @transform_4, window_bounds = array<i64: 128, 128>}, {transform_indices = @transform_5, window_bounds = array<i64: 128, 128>}]} {
    %c0_i32 = arith.constant 0 : i32
    %0 = arith.cmpi eq, %arg1, %c0_i32 : i32
    %1 = arith.extui %0 : i1 to i32
    %c0_i32_0 = arith.constant 0 : i32
    %2 = arith.cmpi ne, %1, %c0_i32_0 : i32
    scf.if %2 {
      %cst_9 = arith.constant 0.000000e+00 : f32
      %15 = vector.broadcast %cst_9 : f32 to vector<128x128xf32>
      %c0_10 = arith.constant 0 : index
      %c0_11 = arith.constant 0 : index
      %16 = vector.load %arg8[%c0_10, %c0_11] : memref<128x128xf32, #tpu.memory_space<vmem>>, vector<128x128xf32>
      tpu.vector_store %arg8[%c0_10, %c0_11], %15 {strides = array<i32>} : memref<128x128xf32, #tpu.memory_space<vmem>>, vector<128x128xf32>,
      %c0_12 = arith.constant 0 : index
      %c0_13 = arith.constant 0 : index
      %17 = vector.load %arg4[%c0_12, %c0_13] : memref<128x128xf32, #tpu.memory_space<vmem>>, vector<128x128xf32>
      %c0_14 = arith.constant 0 : index
      %c0_15 = arith.constant 0 : index
      %18 = vector.load %arg6[%c0_14, %c0_15] : memref<128x128xf32, #tpu.memory_space<vmem>>, vector<128x128xf32>
      %cst_16 = arith.constant dense<0.000000e+00> : vector<128x128xf32>
      %19 = tpu.matmul %17, %18, %cst_16 {dimension_numbers = #tpu.dot_dimension_numbers<[1], [0], [0], [1], [0, 0, 1, 1], [], []>} : vector<128x128xf32>, vector<128x128xf32>, vector<128x128xf32> -> vector<128x128xf32>
      %c0_17 = arith.constant 0 : index
      %c0_18 = arith.constant 0 : index
      %20 = vector.load %arg9[%c0_17, %c0_18] : memref<128x128xf32, #tpu.memory_space<vmem>>, vector<128x128xf32>
      tpu.vector_store %arg9[%c0_17, %c0_18], %19 {strides = array<i32>} : memref<128x128xf32, #tpu.memory_space<vmem>>, vector<128x128xf32>,
    } else {
    }
    %c0 = arith.constant 0 : index
    %c0_1 = arith.constant 0 : index
    %3 = vector.load %arg2[%c0, %c0_1] : memref<128x128xf32, #tpu.memory_space<vmem>>, vector<128x128xf32>
    %c128_i32 = arith.constant 128 : i32
    %4 = arith.muli %arg1, %c128_i32 : i32
    %5 = tpu.assume_multiple %4, 128 : i32
    %6 = arith.index_cast %5 : i32 to index
    %c0_2 = arith.constant 0 : index
    %7 = vector.load %arg3[%6, %c0_2] : memref<128x128xf32, #tpu.memory_space<vmem>>, vector<128x128xf32>
    %c0_3 = arith.constant 0 : index
    %c0_4 = arith.constant 0 : index
    %8 = vector.load %arg8[%c0_3, %c0_4] : memref<128x128xf32, #tpu.memory_space<vmem>>, vector<128x128xf32>
    %cst = arith.constant dense<0.000000e+00> : vector<128x128xf32>
    %9 = tpu.matmul %3, %7, %cst {dimension_numbers = #tpu.dot_dimension_numbers<[1], [0], [0], [1], [0, 0, 1, 1], [], []>} : vector<128x128xf32>, vector<128x128xf32>, vector<128x128xf32> -> vector<128x128xf32>
    %10 = arith.addf %8, %9 : vector<128x128xf32>
    %c0_5 = arith.constant 0 : index
    %c0_6 = arith.constant 0 : index
    %11 = vector.load %arg8[%c0_5, %c0_6] : memref<128x128xf32, #tpu.memory_space<vmem>>, vector<128x128xf32>
    tpu.vector_store %arg8[%c0_5, %c0_6], %10 {strides = array<i32>} : memref<128x128xf32, #tpu.memory_space<vmem>>, vector<128x128xf32>,
    %c0_i32_7 = arith.constant 0 : i32
    %12 = arith.cmpi eq, %arg1, %c0_i32_7 : i32
    %13 = arith.extui %12 : i1 to i32
    %c0_i32_8 = arith.constant 0 : i32
    %14 = arith.cmpi ne, %13, %c0_i32_8 : i32
    scf.if %14 {
      %c0_9 = arith.constant 0 : index
      %c0_10 = arith.constant 0 : index
      %15 = vector.load %arg8[%c0_9, %c0_10] : memref<128x128xf32, #tpu.memory_space<vmem>>, vector<128x128xf32>
      %c0_11 = arith.constant 0 : index
      %c0_12 = arith.constant 0 : index
      %16 = vector.load %arg5[%c0_11, %c0_12] : memref<128x128xf32, #tpu.memory_space<vmem>>, vector<128x128xf32>
      %cst_13 = arith.constant dense<0.000000e+00> : vector<128x128xf32>
      %17 = tpu.matmul %15, %16, %cst_13 {dimension_numbers = #tpu.dot_dimension_numbers<[1], [0], [0], [1], [0, 0, 1, 1], [], []>} : vector<128x128xf32>, vector<128x128xf32>, vector<128x128xf32> -> vector<128x128xf32>
      %c0_14 = arith.constant 0 : index
      %c0_15 = arith.constant 0 : index
      %18 = vector.load %arg9[%c0_14, %c0_15] : memref<128x128xf32, #tpu.memory_space<vmem>>, vector<128x128xf32>
      %19 = arith.addf %17, %18 : vector<128x128xf32>
      %c0_16 = arith.constant 0 : index
      %c0_17 = arith.constant 0 : index
      %20 = vector.load %arg7[%c0_16, %c0_17] : memref<128x128xf32, #tpu.memory_space<vmem>>, vector<128x128xf32>
      tpu.vector_store %arg7[%c0_16, %c0_17], %19 {strides = array<i32>} : memref<128x128xf32, #tpu.memory_space<vmem>>, vector<128x128xf32>,
    } else {
    }
    return
  }
  func.func @transform_0(%arg0: i32, %arg1: i32) -> (i32, i32) {
    %c0_i32 = arith.constant 0 : i32
    return %arg0, %arg1 : i32, i32
  }
  func.func @transform_1(%arg0: i32, %arg1: i32) -> (i32, i32) {
    %c0_i32 = arith.constant 0 : i32
    %c0_i32_0 = arith.constant 0 : i32
    %c0_i32_1 = arith.constant 0 : i32
    return %c0_i32, %c0_i32_0 : i32, i32
  }
  func.func @transform_2(%arg0: i32, %arg1: i32) -> (i32, i32) {
    %c0_i32 = arith.constant 0 : i32
    %c0_i32_0 = arith.constant 0 : i32
    return %arg0, %c0_i32 : i32, i32
  }
  func.func @transform_3(%arg0: i32, %arg1: i32) -> (i32, i32) {
    %c0_i32 = arith.constant 0 : i32
    %c0_i32_0 = arith.constant 0 : i32
    %c0_i32_1 = arith.constant 0 : i32
    return %c0_i32, %c0_i32_0 : i32, i32
  }
  func.func @transform_4(%arg0: i32, %arg1: i32) -> (i32, i32) {
    %c0_i32 = arith.constant 0 : i32
    %c0_i32_0 = arith.constant 0 : i32
    %c0_i32_1 = arith.constant 0 : i32
    return %c0_i32, %c0_i32_0 : i32, i32
  }
  func.func @transform_5(%arg0: i32, %arg1: i32) -> (i32, i32) {
    %c0_i32 = arith.constant 0 : i32
    %c0_i32_0 = arith.constant 0 : i32
    return %arg0, %c0_i32 : i32, i32
  }
}

</mosaic_0001>

<bundles_post_ra>
// kernel: tpu_custom_call.1
= control target key start
LH: loop header
LB: loop body
LE: loop exit
PB: predicated region body
PF: predicated region fallthrough
CT: control target
= control target key end

     0   :  { %10 = vsyncpa [#allocation5], 0  ;;  %s1442_s0 = inlined_call_operand.hbm [shape: f32[128,128], index: 0, kind: input, shape index: {}]   ;;  %s1443_s1 = inlined_call_operand.hbm [shape: f32[128,128], index: 1, kind: input, shape index: {}]   ;;  %s1444_s2 = inlined_call_operand.hbm [shape: f32[128,128], index: 2, kind: input, shape index: {}]   ;;  %s1445_s3 = inlined_call_operand.hbm [shape: f32[128,128], index: 3, kind: input, shape index: {}]   ;;  %s1446_s4 = inlined_call_operand.hbm [shape: f32[128,128], index: 4, kind: input, shape index: {}]   ;;  %s1447_s5 = inlined_call_operand.hbm [shape: f32[128,128], index: 5, kind: output, shape index: {}]  }
   0x1   :  { %11 = vsyncpa [#allocation8], 0 }
   0x2   :  { %12 = vsyncpa [#allocation11], 0 }
   0x3   :  { %13 = vsyncpa [#allocation6], 0  ;;  %s1300_s18 = smov [#allocation7]   ;;  %s1301_s20 = smov [#allocation10]  }
   0x4   :  { %s31_s19 = sshll.u32 %s1300_s18, 4  ;;  %s55_s21 = sshll.u32 %s1301_s20, 4  ;;  %s32_s19 = int_to_ptr.vmem [resolvable:$true] %s31_s19  ;;  %s1338_s21 = int_to_ptr.vmem [resolvable:$true] %s55_s21 }
   0x5   :  { %s1160_s24 = scalar_lea.hbm %s1443_s1, 2048 }
   0x6   :  { %p1161_p0 = scmp.ne.s32.totalorder %s1443_s1, %s1160_s24  ;;  %p1164_p1 = scmp.lt.u32.totalorder %s1160_s24, %s1443_s1 }
   0x8   :  { %p1166_p2 = pnand %p1164_p1, %p1161_p0 }
   0xa   :  { %1169 = shalt.err (!%p1166_p2)
}
   0xb   :  { %s1170_s29 = scalar_lea.vmem %s32_s19, 2048  ;;  %p1175_p4 = scmp.lt.s32.totalorder %s32_s19, %s32_s19 }
   0xc   :  { %p1171_p3 = scmp.ne.s32.totalorder %s32_s19, %s1170_s29  ;;  %p1176_p5 = scmp.lt.s32.totalorder %s1170_s29, %s1170_s29 }
   0xe   :  { %p1177_p6 = por %p1176_p5, %p1175_p4 }
  0x10   :  { %p1178_p7 = pnand %p1177_p6, %p1171_p3 }
  0x12   :  { %1181 = shalt.err (!%p1178_p7)
}
  0x13   :  { %s1302_s30 = smov 128   ;;  %s1303_s6 = smov 8  }
  0x14   :  { %37 = dma.hbm_to_vmem [thread:$0]  %s1443_s1, 2048, %s32_s19, [#allocation8], %s1302_s30, %s1302_s30, %s1303_s6  }
  0x15   :  { %s1182_s11 = scalar_lea.hbm %s1445_s3, 2048 }
  0x16   :  { %p1183_p8 = scmp.ne.s32.totalorder %s1445_s3, %s1182_s11  ;;  %p1186_p9 = scmp.lt.u32.totalorder %s1182_s11, %s1445_s3 }
  0x18   :  { %p1188_p10 = pnand %p1186_p9, %p1183_p8 }
  0x1a   :  { %1191 = shalt.err (!%p1188_p10)
}
  0x1b   :  { %s1192_s16 = scalar_lea.vmem %s1338_s21, 2048  ;;  %p1197_p12 = scmp.lt.s32.totalorder %s1338_s21, %s1338_s21 }
  0x1c   :  { %p1193_p11 = scmp.ne.s32.totalorder %s1338_s21, %s1192_s16  ;;  %p1198_p13 = scmp.lt.s32.totalorder %s1192_s16, %s1192_s16 }
  0x1e   :  { %p1199_p0 = por %p1198_p13, %p1197_p12 }
  0x20   :  { %p1200_p1 = pnand %p1199_p0, %p1193_p11 }
  0x22   :  { %1203 = shalt.err (!%p1200_p1)
}
  0x23   :  { %61 = dma.hbm_to_vmem [thread:$0]  %s1445_s3, 2048, %s1338_s21, [#allocation11], %s1302_s30, %s1302_s30, %s1303_s6  }
  0x24   :  { %s1304_s18 = smov [#allocation4]   ;;  %s1305_s20 = smov [#allocation9]  }
  0x25   :  { %s19_s19 = sshll.u32 %s1304_s18, 4  ;;  %s43_s22 = sshll.u32 %s1305_s20, 4  ;;  %s20_s19 = int_to_ptr.vmem [resolvable:$true] %s19_s19  ;;  %s1375_s22 = int_to_ptr.vmem [resolvable:$true] %s43_s22 }
  0x26   :  { %s1204_s25 = scalar_lea.hbm %s1442_s0, 2048 }
  0x27   :  { %p1205_p2 = scmp.ne.s32.totalorder %s1442_s0, %s1204_s25  ;;  %p1208_p3 = scmp.lt.u32.totalorder %s1204_s25, %s1442_s0 }
  0x29   :  { %p1210_p4 = pnand %p1208_p3, %p1205_p2 }
  0x2b   :  { %1213 = shalt.err (!%p1210_p4)
}
  0x2c   :  { %s1214_s3 = scalar_lea.vmem %s20_s19, 2048  ;;  %p1219_p6 = scmp.lt.s32.totalorder %s20_s19, %s20_s19 }
  0x2d   :  { %p1215_p5 = scmp.ne.s32.totalorder %s20_s19, %s1214_s3  ;;  %p1220_p7 = scmp.lt.s32.totalorder %s1214_s3, %s1214_s3 }
  0x2f   :  { %p1221_p8 = por %p1220_p7, %p1219_p6 }
  0x31   :  { %p1222_p9 = pnand %p1221_p8, %p1215_p5 }
  0x33   :  { %1225 = shalt.err (!%p1222_p9)
}
  0x34   :  { %25 = dma.hbm_to_vmem [thread:$0]  %s1442_s0, 2048, %s20_s19, [#allocation5], %s1302_s30, %s1302_s30, %s1303_s6  }
  0x35   :  { %s1226_s10 = scalar_lea.hbm %s1444_s2, 2048 }
  0x36   :  { %p1227_p10 = scmp.ne.s32.totalorder %s1444_s2, %s1226_s10  ;;  %p1230_p11 = scmp.lt.u32.totalorder %s1226_s10, %s1444_s2 }
  0x38   :  { %p1232_p12 = pnand %p1230_p11, %p1227_p10 }
  0x3a   :  { %1235 = shalt.err (!%p1232_p12)
}
  0x3b   :  { %s1236_s15 = scalar_lea.vmem %s1375_s22, 2048  ;;  %p1241_p0 = scmp.lt.s32.totalorder %s1375_s22, %s1375_s22 }
  0x3c   :  { %p1237_p13 = scmp.ne.s32.totalorder %s1375_s22, %s1236_s15  ;;  %p1242_p1 = scmp.lt.s32.totalorder %s1236_s15, %s1236_s15 }
  0x3e   :  { %p1243_p2 = por %p1242_p1, %p1241_p0 }
  0x40   :  { %p1244_p3 = pnand %p1243_p2, %p1237_p13 }
  0x42   :  { %1247 = shalt.err (!%p1244_p3)
}
  0x43   :  { %49 = dma.hbm_to_vmem [thread:$0]  %s1444_s2, 2048, %s1375_s22, [#allocation8], %s1302_s30, %s1302_s30, %s1303_s6  }
  0x44   :  { %s1306_s1 = smov [#allocation12]   ;;  %s1248_s20 = scalar_lea.hbm %s1446_s4, 2048 }
  0x45   :  { %s67_s17 = sshll.u32 %s1306_s1, 4  ;;  %p1249_p4 = scmp.ne.s32.totalorder %s1446_s4, %s1248_s20  ;;  %s68_s17 = int_to_ptr.vmem [resolvable:$true] %s67_s17 }
  0x46   :  { %p1252_p5 = scmp.lt.u32.totalorder %s1248_s20, %s1446_s4 }
  0x48   :  { %p1254_p6 = pnand %p1252_p5, %p1249_p4 }
  0x4a   :  { %1257 = shalt.err (!%p1254_p6)
}
  0x4b   :  { %s1258_s27 = scalar_lea.vmem %s68_s17, 2048  ;;  %p1263_p8 = scmp.lt.s32.totalorder %s68_s17, %s68_s17 }
  0x4c   :  { %p1259_p7 = scmp.ne.s32.totalorder %s68_s17, %s1258_s27  ;;  %p1264_p9 = scmp.lt.s32.totalorder %s1258_s27, %s1258_s27 }
  0x4e   :  { %p1265_p10 = por %p1264_p9, %p1263_p8 }
  0x50   :  { %p1266_p11 = pnand %p1265_p10, %p1259_p7 }
  0x52   :  { %1269 = shalt.err (!%p1266_p11)
}
  0x53   :  { %73 = dma.hbm_to_vmem [thread:$0]  %s1446_s4, 2048, %s68_s17, [#allocation11], %s1302_s30, %s1302_s30, %s1303_s6  }
  0x54   :  { %1292 = dma.done.wait [#allocation5], 2048  }
  0x55   :  { %1293 = vsyncadd [#allocation5], 4294965248 }
  0x56   :  { %1294 = dma.done.wait [#allocation8], 4096  }
  0x57   :  { %1295 = vsyncadd [#allocation8], 4294963200 }
  0x58   :  { %1296 = dma.done.wait [#allocation11], 4096  }
  0x59   :  { %1297 = vsyncadd [#allocation11], 4294963200  ;;  %v320_v0 = vld [vmem:[#allocation7] sm:$0xff]  ;;  %v321_v1 = vld [vmem:[#allocation7 + $0x8] sm:$0xff]  ;;  %s1307_s4 = smov [#allocation13]  }
  0x5a   :  { %v322_v2 = vld [vmem:[#allocation7 + $0x10] sm:$0xff]  ;;  %v1056_v3 = vpack.c.bf16 %v321_v1, %v320_v0  ;;  %v323_v4 = vld [vmem:[#allocation7 + $0x18] sm:$0xff]  ;;  %v324_v6 = vld [vmem:[#allocation7 + $0x20] sm:$0xff]  ;;  %s746_s28 = sshll.u32 %s1307_s4, 4  ;;  %s747_s28 = int_to_ptr.vmem [resolvable:$true] %s746_s28 }
  0x5b   :  { %v1060_v5 = vpack.c.bf16 %v323_v4, %v322_v2  ;;  %v325_v7 = vld [vmem:[#allocation7 + $0x28] sm:$0xff]  ;;  %v302_v9 = vld [vmem:[#allocation4] sm:$0xff]  ;;  %v326_v10 = vld [vmem:[#allocation7 + $0x30] sm:$0xff]  ;;  %s1270_s29 = scalar_lea.vmem %s747_s28, 2048  ;;  %p1275_p13 = scmp.lt.s32.totalorder %s747_s28, %s747_s28 }
  0x5c   :  { %1057 = vmatprep.subr.bf16.mxu1 %v1056_v3  ;;  %v1064_v8 = vpack.c.bf16 %v325_v7, %v324_v6  ;;  %v327_v11 = vld [vmem:[#allocation7 + $0x38] sm:$0xff]  ;;  %944 = vmatprep.mubr.f32.mxu1 %v302_v9  ;;  %v328_v13 = vld [vmem:[#allocation7 + $0x40] sm:$0xff]  ;;  %v329_v14 = vld [vmem:[#allocation7 + $0x48] sm:$0xff]  ;;  %p1271_p12 = scmp.ne.s32.totalorder %s747_s28, %s1270_s29  ;;  %p1276_p0 = scmp.lt.s32.totalorder %s1270_s29, %s1270_s29 }
  0x5d   :  { %1059 = vmatpush3.bf16.msra.mxu1 %v1056_v3  ;;  %v1068_v12 = vpack.c.bf16 %v327_v11, %v326_v10  ;;  %v125_v15 = vld [vmem:[#allocation12] sm:$0xff]  ;;  %v126_v16 = vld [vmem:[#allocation12 + $0x8] sm:$0xff]  ;;  %v127_v17 = vld [vmem:[#allocation12 + $0x10] sm:$0xff]  ;;  %v1072_v21 = vpack.c.bf16 %v329_v14, %v328_v13 }
  0x5e   :  { %1061 = vmatprep.subr.bf16.mxu1 %v1060_v5  ;;  %v128_v18 = vld [vmem:[#allocation12 + $0x18] sm:$0xff]  ;;  %v1024_v19 = vpack.c.bf16 %v126_v16, %v125_v15  ;;  %v129_v22 = vld [vmem:[#allocation12 + $0x20] sm:$0xff]  ;;  %v130_v23 = vld [vmem:[#allocation12 + $0x28] sm:$0xff]  ;;  %p1277_p1 = por %p1276_p0, %p1275_p13 }
  0x5f   :  { %v1028_v20 = vpack.c.bf16 %v128_v18, %v127_v17  ;;  %v330_v24 = vld [vmem:[#allocation7 + $0x50] sm:$0xff]  ;;  %v331_v25 = vld [vmem:[#allocation7 + $0x58] sm:$0xff]  ;;  %v1032_v26 = vpack.c.bf16 %v130_v23, %v129_v22  ;;  %v109_v27 = vld [vmem:[#allocation9] sm:$0xff] }
  0x60   :  { %1025 = vmatprep.subr.bf16.mxu0 %v1024_v19  ;;  %v1076_v28 = vpack.c.bf16 %v331_v25, %v330_v24  ;;  %v131_v29 = vld [vmem:[#allocation12 + $0x30] sm:$0xff]  ;;  %v132_v30 = vld [vmem:[#allocation12 + $0x38] sm:$0xff]  ;;  %888 = vmatprep.mubr.f32.mxu0 %v109_v27  ;;  %v332_v31 = vld [vmem:[#allocation7 + $0x60] sm:$0xff]  ;;  %p1278_p2 = pnand %p1277_p1, %p1271_p12 }
  0x61   :  { %1063 = vmatpush3.bf16.msra.mxu1 %v1060_v5  ;;  %1027 = vmatpush3.bf16.msra.mxu0 %v1024_v19  ;;  %v333_v32 = vld [vmem:[#allocation7 + $0x68] sm:$0xff]  ;;  %v1036_v33 = vpack.c.bf16 %v132_v30, %v131_v29  ;;  %v133_v35 = vld [vmem:[#allocation12 + $0x40] sm:$0xff]  ;;  %v334_v37 = vld [vmem:[#allocation7 + $0x70] sm:$0xff] }
  0x62   :  { %1065 = vmatprep.subr.bf16.mxu1 %v1064_v8  ;;  %1029 = vmatprep.subr.bf16.mxu0 %v1028_v20  ;;  %v1080_v34 = vpack.c.bf16 %v333_v32, %v332_v31  ;;  %v134_v36 = vld [vmem:[#allocation12 + $0x48] sm:$0xff]  ;;  %v335_v38 = vld [vmem:[#allocation7 + $0x78] sm:$0xff]  ;;  %v135_v41 = vld [vmem:[#allocation12 + $0x50] sm:$0xff] }
  0x63   :  { %v1040_v39 = vpack.c.bf16 %v134_v36, %v133_v35  ;;  %v1084_v40 = vpack.c.bf16 %v335_v38, %v334_v37  ;;  %v136_v42 = vld [vmem:[#allocation12 + $0x58] sm:$0xff]  ;;  %v548_v44 = vld [vmem:[#allocation10] sm:$0xff]  ;;  %v549_v45 = vld [vmem:[#allocation10 + $0x8] sm:$0xff] }
  0x64   :  { %v1044_v43 = vpack.c.bf16 %v136_v42, %v135_v41  ;;  %v137_v46 = vld [vmem:[#allocation12 + $0x60] sm:$0xff]  ;;  %v138_v47 = vld [vmem:[#allocation12 + $0x68] sm:$0xff]  ;;  %v1088_v48 = vpack.c.bf16 %v549_v45, %v548_v44  ;;  %v304_v50 = vld [vmem:[#allocation4 + $0x10] sm:$0xff] }
  0x65   :  { %1067 = vmatpush3.bf16.msra.mxu1 %v1064_v8  ;;  %1031 = vmatpush3.bf16.msra.mxu0 %v1028_v20  ;;  %v303_v49 = vld [vmem:[#allocation4 + $0x8] sm:$0xff]  ;;  %v1048_v51 = vpack.c.bf16 %v138_v47, %v137_v46  ;;  %v139_v52 = vld [vmem:[#allocation12 + $0x70] sm:$0xff]  ;;  %v140_v53 = vld [vmem:[#allocation12 + $0x78] sm:$0xff] }
  0x66   :  { %1069 = vmatprep.subr.bf16.mxu1 %v1068_v12  ;;  %1033 = vmatprep.subr.bf16.mxu0 %v1032_v26  ;;  %v550_v54 = vld [vmem:[#allocation10 + $0x10] sm:$0xff]  ;;  %v551_v55 = vld [vmem:[#allocation10 + $0x18] sm:$0xff]  ;;  %v1052_v57 = vpack.c.bf16 %v140_v53, %v139_v52  ;;  %v306_v59 = vld [vmem:[#allocation4 + $0x20] sm:$0xff] }
  0x67   :  { %v305_v56 = vld [vmem:[#allocation4 + $0x18] sm:$0xff]  ;;  %v1092_v58 = vpack.c.bf16 %v551_v55, %v550_v54  ;;  %v552_v60 = vld [vmem:[#allocation10 + $0x20] sm:$0xff]  ;;  %v553_v61 = vld [vmem:[#allocation10 + $0x28] sm:$0xff] }
  0x68   :  { %v307_v62 = vld [vmem:[#allocation4 + $0x28] sm:$0xff]  ;;  %v1096_v63 = vpack.c.bf16 %v553_v61, %v552_v60  ;;  %v308_v0 = vld [vmem:[#allocation4 + $0x30] sm:$0xff]  ;;  %v555_v2 = vld [vmem:[#allocation10 + $0x38] sm:$0xff] }
  0x69   :  { %1071 = vmatpush3.bf16.msra.mxu1 %v1068_v12  ;;  %1035 = vmatpush3.bf16.msra.mxu0 %v1032_v26  ;;  %v554_v1 = vld [vmem:[#allocation10 + $0x30] sm:$0xff]  ;;  %v110_v3 = vld [vmem:[#allocation9 + $0x8] sm:$0xff]  ;;  %v309_v4 = vld [vmem:[#allocation4 + $0x38] sm:$0xff] }
  0x6a   :  { %1073 = vmatprep.subr.bf16.mxu1 %v1072_v21  ;;  %1037 = vmatprep.subr.bf16.mxu0 %v1036_v33  ;;  %v310_v5 = vld [vmem:[#allocation4 + $0x40] sm:$0xff]  ;;  %v1100_v6 = vpack.c.bf16 %v555_v2, %v554_v1  ;;  %v111_v7 = vld [vmem:[#allocation9 + $0x10] sm:$0xff]  ;;  %v557_v9 = vld [vmem:[#allocation10 + $0x48] sm:$0xff] }
  0x6b   :  { %v556_v8 = vld [vmem:[#allocation10 + $0x40] sm:$0xff]  ;;  %v112_v10 = vld [vmem:[#allocation9 + $0x18] sm:$0xff]  ;;  %v311_v11 = vld [vmem:[#allocation4 + $0x48] sm:$0xff] }
  0x6c   :  { %v312_v12 = vld [vmem:[#allocation4 + $0x50] sm:$0xff]  ;;  %v1104_v13 = vpack.c.bf16 %v557_v9, %v556_v8  ;;  %v113_v14 = vld [vmem:[#allocation9 + $0x20] sm:$0xff]  ;;  %v559_v16 = vld [vmem:[#allocation10 + $0x58] sm:$0xff] }
  0x6d   :  { %1075 = vmatpush3.bf16.msra.mxu1 %v1072_v21  ;;  %1039 = vmatpush3.bf16.msra.mxu0 %v1036_v33  ;;  %v558_v15 = vld [vmem:[#allocation10 + $0x50] sm:$0xff]  ;;  %v114_v17 = vld [vmem:[#allocation9 + $0x28] sm:$0xff]  ;;  %v313_v18 = vld [vmem:[#allocation4 + $0x58] sm:$0xff] }
  0x6e   :  { %1077 = vmatprep.subr.bf16.mxu1 %v1076_v28  ;;  %1041 = vmatprep.subr.bf16.mxu0 %v1040_v39  ;;  %v314_v19 = vld [vmem:[#allocation4 + $0x60] sm:$0xff]  ;;  %v1108_v20 = vpack.c.bf16 %v559_v16, %v558_v15  ;;  %v115_v21 = vld [vmem:[#allocation9 + $0x30] sm:$0xff]  ;;  %v561_v23 = vld [vmem:[#allocation10 + $0x68] sm:$0xff] }
  0x6f   :  { %v560_v22 = vld [vmem:[#allocation10 + $0x60] sm:$0xff]  ;;  %v116_v24 = vld [vmem:[#allocation9 + $0x38] sm:$0xff]  ;;  %v315_v25 = vld [vmem:[#allocation4 + $0x68] sm:$0xff] }
  0x70   :  { %v316_v26 = vld [vmem:[#allocation4 + $0x70] sm:$0xff]  ;;  %v1112_v27 = vpack.c.bf16 %v561_v23, %v560_v22  ;;  %v563_v30 = vld [vmem:[#allocation10 + $0x78] sm:$0xff]  ;;  %v118_v31 = vld [vmem:[#allocation9 + $0x48] sm:$0xff] }
  0x71   :  { %1079 = vmatpush3.bf16.msra.mxu1 %v1076_v28  ;;  %1043 = vmatpush3.bf16.msra.mxu0 %v1040_v39  ;;  %v117_v28 = vld [vmem:[#allocation9 + $0x40] sm:$0xff]  ;;  %v562_v29 = vld [vmem:[#allocation10 + $0x70] sm:$0xff]  ;;  %v317_v32 = vld [vmem:[#allocation4 + $0x78] sm:$0xff] }
  0x72   :  { %1081 = vmatprep.subr.bf16.mxu1 %v1080_v34  ;;  %1045 = vmatprep.subr.bf16.mxu0 %v1044_v43  ;;  %v1116_v33 = vpack.c.bf16 %v563_v30, %v562_v29  ;;  %v120_v35 = vld [vmem:[#allocation9 + $0x58] sm:$0xff]  ;;  %v121_v36 = vld [vmem:[#allocation9 + $0x60] sm:$0xff]  ;;  %v122_v37 = vld [vmem:[#allocation9 + $0x68] sm:$0xff] }
  0x73   :  { %v123_v38 = vld [vmem:[#allocation9 + $0x70] sm:$0xff]  ;;  %v124_v39 = vld [vmem:[#allocation9 + $0x78] sm:$0xff] }
  0x75   :  { %1083 = vmatpush3.bf16.msra.mxu1 %v1080_v34  ;;  %1047 = vmatpush3.bf16.msra.mxu0 %v1044_v43  ;;  %v119_v34 = vld [vmem:[#allocation9 + $0x50] sm:$0xff] }
  0x76   :  { %1085 = vmatprep.subr.bf16.mxu1 %v1084_v40  ;;  %1049 = vmatprep.subr.bf16.mxu0 %v1048_v51 }
  0x79   :  { %1087 = vmatpush3.bf16.msra.mxu1 %v1084_v40  ;;  %1051 = vmatpush3.bf16.msra.mxu0 %v1048_v51 }
  0x7a   :  { %1120 = vmatprep.subr.bf16.mxu1 %v1088_v48  ;;  %1053 = vmatprep.subr.bf16.mxu0 %v1052_v57 }
  0x7c   :  { %945 = vmatmul.mubr.f32.vlgmr.msra.gmra.mrb[0].mxu1 %v303_v49 }
  0x7d   :  { %947 = vmatprep.mubr.f32.mxu1 %v304_v50  ;;  %1128 = vmatpush3.bf16.msra.mxu1 %v1088_v48 }
  0x7e   :  { %1121 = vmatprep.subr.bf16.mxu1 %v1092_v58  ;;  %1055 = vmatpush3.bf16.msra.mxu0 %v1052_v57 }
  0x7f   :  { %1089 = vmatprep.subr.bf16.mxu0 %v1088_v48 }
  0x80   :  { %948 = vmatmul.mubr.f32.gmra.mrb[2].mxu1 %v305_v56 }
  0x81   :  { %950 = vmatprep.mubr.f32.mxu1 %v306_v59  ;;  %1129 = vmatpush3.bf16.msra.mxu1 %v1092_v58 }
  0x82   :  { %1122 = vmatprep.subr.bf16.mxu1 %v1096_v63  ;;  %889 = vmatmul.mubr.f32.vlgmr.msra.gmra.mrb[0].mxu0 %v110_v3 }
  0x83   :  { %1091 = vmatpush3.bf16.msra.mxu0 %v1088_v48  ;;  %891 = vmatprep.mubr.f32.mxu0 %v111_v7 }
  0x84   :  { %951 = vmatmul.mubr.f32.gmra.mrb[4].mxu1 %v307_v62  ;;  %1093 = vmatprep.subr.bf16.mxu0 %v1092_v58 }
  0x85   :  { %953 = vmatprep.mubr.f32.mxu1 %v308_v0  ;;  %1130 = vmatpush3.bf16.msra.mxu1 %v1096_v63 }
  0x86   :  { %1123 = vmatprep.subr.bf16.mxu1 %v1100_v6  ;;  %892 = vmatmul.mubr.f32.gmra.mrb[2].mxu0 %v112_v10 }
  0x87   :  { %1095 = vmatpush3.bf16.msra.mxu0 %v1092_v58  ;;  %894 = vmatprep.mubr.f32.mxu0 %v113_v14 }
  0x88   :  { %954 = vmatmul.mubr.f32.gmra.mrb[6].mxu1 %v309_v4  ;;  %1097 = vmatprep.subr.bf16.mxu0 %v1096_v63 }
  0x89   :  { %956 = vmatprep.mubr.f32.mxu1 %v310_v5  ;;  %1131 = vmatpush3.bf16.msra.mxu1 %v1100_v6 }
  0x8a   :  { %1124 = vmatprep.subr.bf16.mxu1 %v1104_v13  ;;  %895 = vmatmul.mubr.f32.gmra.mrb[4].mxu0 %v114_v17 }
  0x8b   :  { %1099 = vmatpush3.bf16.msra.mxu0 %v1096_v63  ;;  %897 = vmatprep.mubr.f32.mxu0 %v115_v21 }
  0x8c   :  { %957 = vmatmul.mubr.f32.gmra.mrb[8].mxu1 %v311_v11  ;;  %1101 = vmatprep.subr.bf16.mxu0 %v1100_v6 }
  0x8d   :  { %959 = vmatprep.mubr.f32.mxu1 %v312_v12  ;;  %1132 = vmatpush3.bf16.msra.mxu1 %v1104_v13 }
  0x8e   :  { %1125 = vmatprep.subr.bf16.mxu1 %v1108_v20  ;;  %898 = vmatmul.mubr.f32.gmra.mrb[6].mxu0 %v116_v24 }
  0x8f   :  { %1103 = vmatpush3.bf16.msra.mxu0 %v1100_v6  ;;  %900 = vmatprep.mubr.f32.mxu0 %v117_v28 }
  0x90   :  { %960 = vmatmul.mubr.f32.gmra.mrb[10].mxu1 %v313_v18  ;;  %1105 = vmatprep.subr.bf16.mxu0 %v1104_v13 }
  0x91   :  { %962 = vmatprep.mubr.f32.mxu1 %v314_v19  ;;  %1133 = vmatpush3.bf16.msra.mxu1 %v1108_v20 }
  0x92   :  { %1126 = vmatprep.subr.bf16.mxu1 %v1112_v27  ;;  %901 = vmatmul.mubr.f32.gmra.mrb[8].mxu0 %v118_v31 }
  0x93   :  { %1107 = vmatpush3.bf16.msra.mxu0 %v1104_v13  ;;  %903 = vmatprep.mubr.f32.mxu0 %v119_v34 }
  0x94   :  { %963 = vmatmul.mubr.f32.gmra.mrb[12].mxu1 %v315_v25  ;;  %1109 = vmatprep.subr.bf16.mxu0 %v1108_v20 }
  0x95   :  { %965 = vmatprep.mubr.f32.mxu1 %v316_v26  ;;  %1134 = vmatpush3.bf16.msra.mxu1 %v1112_v27 }
  0x96   :  { %1127 = vmatprep.subr.bf16.mxu1 %v1116_v33  ;;  %904 = vmatmul.mubr.f32.gmra.mrb[10].mxu0 %v120_v35 }
  0x97   :  { %1111 = vmatpush3.bf16.msra.mxu0 %v1108_v20  ;;  %906 = vmatprep.mubr.f32.mxu0 %v121_v36 }
  0x98   :  { %966 = vmatmul.mubr.f32.gmra.mrb[14].mxu1 %v317_v32  ;;  %1113 = vmatprep.subr.bf16.mxu0 %v1112_v27 }
  0x99   :  { %1135 = vmatpush3.bf16.msra.mxu1 %v1116_v33 }
  0x9a   :  { %907 = vmatmul.mubr.f32.gmra.mrb[12].mxu0 %v122_v37 }
  0x9b   :  { %1115 = vmatpush3.bf16.msra.mxu0 %v1112_v27  ;;  %909 = vmatprep.mubr.f32.mxu0 %v123_v38 }
  0x9c   :  { %1117 = vmatprep.subr.bf16.mxu0 %v1116_v33 }
  0x9e   :  { %910 = vmatmul.mubr.f32.gmra.mrb[14].mxu0 %v124_v39 }
  0x9f   :  { %1119 = vmatpush3.bf16.msra.mxu0 %v1116_v33 }
 0x14f   :  { %v946_v40 = vpop.f32.mrb[0].mxu1 }
 0x150   :  { %v418_v41 = vpop.f32.mrb[1].mxu1 }
 0x151   :  { %1000 = vmatprep.mubr.f32.mxu0 %v418_v41 }
 0x152   :  { %1001 = vmatmul.mubr.f32.vlgmr.msra.gmra.mrb[0].mxu0 %v946_v40 }
 0x153   :  { %v949_v42 = vpop.f32.mrb[2].mxu1 }
 0x154   :  { %v428_v43 = vpop.f32.mrb[3].mxu1 }
 0x155   :  { %1003 = vmatprep.mubr.f32.mxu0 %v428_v43 }
 0x156   :  { %1004 = vmatmul.mubr.f32.gmra.mrb[2].mxu0 %v949_v42 }
 0x157   :  { %v952_v44 = vpop.f32.mrb[4].mxu1 }
 0x158   :  { %v438_v45 = vpop.f32.mrb[5].mxu1 }
 0x159   :  { %1006 = vmatprep.mubr.f32.mxu0 %v438_v45 }
 0x15a   :  { %1007 = vmatmul.mubr.f32.gmra.mrb[4].mxu0 %v952_v44 }
 0x15b   :  { %v955_v46 = vpop.f32.mrb[6].mxu1 }
 0x15c   :  { %v448_v47 = vpop.f32.mrb[7].mxu1 }
 0x15d   :  { %1009 = vmatprep.mubr.f32.mxu0 %v448_v47 }
 0x15e   :  { %1010 = vmatmul.mubr.f32.gmra.mrb[6].mxu0 %v955_v46 }
 0x15f   :  { %v958_v48 = vpop.f32.mrb[8].mxu1 }
 0x160   :  { %v458_v49 = vpop.f32.mrb[9].mxu1 }
 0x161   :  { %1012 = vmatprep.mubr.f32.mxu1 %v458_v49 }
 0x162   :  { %1013 = vmatmul.mubr.f32.vlgmr.msra.gmra.mrb[16].mxu1 %v958_v48 }
 0x163   :  { %v961_v50 = vpop.f32.mrb[10].mxu1 }
 0x164   :  { %v468_v51 = vpop.f32.mrb[11].mxu1 }
 0x165   :  { %1015 = vmatprep.mubr.f32.mxu1 %v468_v51  ;;  %v902_v54 = vpop.f32.mrb[8].mxu0 }
 0x166   :  { %1016 = vmatmul.mubr.f32.gmra.mrb[18].mxu1 %v961_v50  ;;  %v247_v56 = vpop.f32.mrb[9].mxu0 }
 0x167   :  { %v964_v52 = vpop.f32.mrb[12].mxu1 }
 0x168   :  { %v478_v53 = vpop.f32.mrb[13].mxu1 }
 0x169   :  { %1018 = vmatprep.mubr.f32.mxu1 %v478_v53  ;;  %v905_v58 = vpop.f32.mrb[10].mxu0 }
 0x16a   :  { %1019 = vmatmul.mubr.f32.gmra.mrb[20].mxu1 %v964_v52  ;;  %v257_v59 = vpop.f32.mrb[11].mxu0 }
 0x16b   :  { %v967_v55 = vpop.f32.mrb[14].mxu1 }
 0x16c   :  { %v488_v57 = vpop.f32.mrb[15].mxu1 }
 0x16d   :  { %1021 = vmatprep.mubr.f32.mxu1 %v488_v57  ;;  %v908_v60 = vpop.f32.mrb[12].mxu0 }
 0x16e   :  { %1022 = vmatmul.mubr.f32.gmra.mrb[22].mxu1 %v967_v55  ;;  %v267_v61 = vpop.f32.mrb[13].mxu0 }
 0x171   :  { %v911_v62 = vpop.f32.mrb[14].mxu0 }
 0x172   :  { %v277_v63 = vpop.f32.mrb[15].mxu0 }
 0x225   :  { %v1002_v0 = vpop.f32.mrb[0].mxu0 }
 0x226   :  { %726 = vst [vmem:[#allocation13 + $0x8] sm:$0xff] %v1002_v0  ;;  %v646_v1 = vpop.f32.mrb[1].mxu0 }
 0x227   :  { %725 = vst [vmem:[#allocation13] sm:$0xff] %v646_v1 }
 0x229   :  { %v1005_v2 = vpop.f32.mrb[2].mxu0 }
 0x22a   :  { %728 = vst [vmem:[#allocation13 + $0x18] sm:$0xff] %v1005_v2  ;;  %v656_v3 = vpop.f32.mrb[3].mxu0 }
 0x22b   :  { %727 = vst [vmem:[#allocation13 + $0x10] sm:$0xff] %v656_v3 }
 0x22d   :  { %v1008_v4 = vpop.f32.mrb[4].mxu0 }
 0x22e   :  { %730 = vst [vmem:[#allocation13 + $0x28] sm:$0xff] %v1008_v4  ;;  %v666_v5 = vpop.f32.mrb[5].mxu0 }
 0x22f   :  { %729 = vst [vmem:[#allocation13 + $0x20] sm:$0xff] %v666_v5 }
 0x231   :  { %v1011_v6 = vpop.f32.mrb[6].mxu0 }
 0x232   :  { %732 = vst [vmem:[#allocation13 + $0x38] sm:$0xff] %v1011_v6  ;;  %v676_v7 = vpop.f32.mrb[7].mxu0 }
 0x233   :  { %731 = vst [vmem:[#allocation13 + $0x30] sm:$0xff] %v676_v7 }
 0x235   :  { %v1014_v8 = vpop.f32.mrb[16].mxu1 }
 0x236   :  { %v692_v9 = vadd.f32 %v1014_v8, %v902_v54  ;;  %v686_v10 = vpop.f32.mrb[17].mxu1 }
 0x237   :  { %v687_v11 = vadd.f32 %v686_v10, %v247_v56 }
 0x238   :  { %734 = vst [vmem:[#allocation13 + $0x48] sm:$0xff] %v692_v9 }
 0x239   :  { %733 = vst [vmem:[#allocation13 + $0x40] sm:$0xff] %v687_v11  ;;  %v1017_v12 = vpop.f32.mrb[18].mxu1 }
 0x23a   :  { %v702_v13 = vadd.f32 %v1017_v12, %v905_v58  ;;  %v696_v14 = vpop.f32.mrb[19].mxu1 }
 0x23b   :  { %v697_v15 = vadd.f32 %v696_v14, %v257_v59 }
 0x23c   :  { %736 = vst [vmem:[#allocation13 + $0x58] sm:$0xff] %v702_v13 }
 0x23d   :  { %735 = vst [vmem:[#allocation13 + $0x50] sm:$0xff] %v697_v15  ;;  %v1020_v16 = vpop.f32.mrb[20].mxu1 }
 0x23e   :  { %v712_v17 = vadd.f32 %v1020_v16, %v908_v60  ;;  %v706_v18 = vpop.f32.mrb[21].mxu1 }
 0x23f   :  { %v707_v19 = vadd.f32 %v706_v18, %v267_v61 }
 0x240   :  { %738 = vst [vmem:[#allocation13 + $0x68] sm:$0xff] %v712_v17 }
 0x241   :  { %737 = vst [vmem:[#allocation13 + $0x60] sm:$0xff] %v707_v19  ;;  %v1023_v20 = vpop.f32.mrb[22].mxu1 }
 0x242   :  { %v722_v21 = vadd.f32 %v1023_v20, %v911_v62  ;;  %v716_v22 = vpop.f32.mrb[23].mxu1 }
 0x243   :  { %v717_v23 = vadd.f32 %v716_v22, %v277_v63 }
 0x244   :  { %740 = vst [vmem:[#allocation13 + $0x78] sm:$0xff] %v722_v21 }
 0x245   :  { %739 = vst [vmem:[#allocation13 + $0x70] sm:$0xff] %v717_v23 }
 0x246   :  { %1281 = shalt.err (!%p1278_p2)
}
 0x247   :  { %s1282_s7 = scalar_lea.hbm %s1447_s5, 2048 }
 0x248   :  { %p1283_p3 = scmp.ne.s32.totalorder %s1447_s5, %s1282_s7  ;;  %p1286_p4 = scmp.lt.u32.totalorder %s1282_s7, %s1447_s5 }
 0x24a   :  { %p1288_p5 = pnand %p1286_p4, %p1283_p3 }
 0x24c   :  { %1291 = shalt.err (!%p1288_p5)
}
 0x24d   :  { %752 = dma.vmem_to_hbm [thread:$0]  %s747_s28, 2048, %s1447_s5, [#allocation6], %s1302_s30, %s1302_s30, %s1303_s6  }
 0x24e   :  { %1298 = dma.done.wait [#allocation6], 2048  }
 0x24f   :  { %1299 = vsyncadd [#allocation6], 4294965248 }
 0x250   :  { %756 = vsyncpa [#allocation5], 1 }
 0x251   :  { %757 = vsyncpa [#allocation8], 1 }
 0x252   :  { %758 = vsyncpa [#allocation11], 1 }
 0x253   :  { %759 = vsyncpa [#allocation6], 1 }

</bundles_post_ra>
